<compile_context>
chip_gen: v6e
topology: v6e:2x2x1
jax: 0.10.0
libtpu: 0.0.40
codegen_flags: <defaults>
</compile_context>

<pallas_src>
import math

import jax
import jax.numpy as jnp
from jax.experimental import pallas as pl
from jax.experimental.pallas import tpu as pltpu


def _round_up(x, m):
    return (x + m - 1) // m * m


# ---------------------------------------------------------------------------
# Pallas kernel: fused 1x1-conv (weight-stationary matmul) + bias + SiLU
# ---------------------------------------------------------------------------
def _conv1x1_silu_kernel(x_ref, w_ref, b_ref, o_ref):
    # x_ref: (1, C, t_hw) f32   w_ref: (tn, C) bf16
    # b_ref: (tn, 1)    f32     o_ref: (1, tn, t_hw) f32
    x = x_ref[0].astype(jnp.bfloat16)                       # VMEM-local cast
    y = jnp.dot(w_ref[...], x, preferred_element_type=jnp.float32)  # (tn, t_hw)
    y = y + b_ref[...]                                      # bias bcast over lanes
    sig = pl.reciprocal(1.0 + jnp.exp(-y), approx=True)     # EUP exp + EUP vrcp
    o_ref[0] = (y * sig).astype(o_ref.dtype)


def conv1x1_silu_nchw(x, weight, bias, *, tn=1024, t_hw=1024):
    """Fused 1x1 conv + bias + SiLU, reading NCHW directly.

    x: (B, C, H, W) f32, weight: (N, C), bias: (N,)  ->  (B, N, H*W) f32.
    """
    B, C, H, W = x.shape
    N = weight.shape[0]
    HW = H * W

    x3 = x.reshape(B, C, HW)                  # free reshape, no transpose

    # Spatial tiling (lane axis): pad to lane alignment / tile multiple.
    HW_pad = _round_up(HW, 128)
    t_hw = min(t_hw, HW_pad)
    HW_pad = _round_up(HW_pad, t_hw)
    if HW_pad != HW:
        x3 = jnp.pad(x3, ((0, 0), (0, 0), (0, HW_pad - HW)))

    # Output-channel tiling (sublane axis).
    N_pad = _round_up(N, 8)
    tn = min(tn, N_pad)
    N_pad = _round_up(N_pad, tn)
    w_p, b_p = weight, bias
    if N_pad != N:
        w_p = jnp.pad(w_p, ((0, N_pad - N), (0, 0)))
        b_p = jnp.pad(b_p, ((0, N_pad - N),))
    w_bf = w_p if w_p.dtype == jnp.bfloat16 else w_p.astype(jnp.bfloat16)
    b2 = b_p.reshape(N_pad, 1).astype(jnp.float32)

    grid = (B, HW_pad // t_hw, N_pad // tn)

    out = pl.pallas_call(
        _conv1x1_silu_kernel,
        out_shape=jax.ShapeDtypeStruct((B, N_pad, HW_pad), jnp.float32),
        grid_spec=pltpu.PrefetchScalarGridSpec(
            num_scalar_prefetch=0,
            grid=grid,
            in_specs=[
                pl.BlockSpec((1, C, t_hw), lambda b, p, n: (b, 0, p)),   # x (NCHW)
                pl.BlockSpec((tn, C),      lambda b, p, n: (n, 0)),      # weight
                pl.BlockSpec((tn, 1),      lambda b, p, n: (n, 0)),      # bias
            ],
            out_specs=pl.BlockSpec((1, tn, t_hw), lambda b, p, n: (b, n, p)),
        ),
        compiler_params=pltpu.CompilerParams(
            dimension_semantics=("parallel", "parallel", "parallel"),
            vmem_limit_bytes=48 * 1024 * 1024,   # fits v7x (64 MiB) with headroom
        ),
    )(x3, w_bf, b2)

    if N_pad != N or HW_pad != HW:
        out = out[:, :N, :HW]
    return out


# ---------------------------------------------------------------------------
# Module: parameter init + forward
# ---------------------------------------------------------------------------
def init_pixel_shuffle_upsample_params(key, dim, dim_out=None):
    """Replicates PixelShuffleUpsample.__init__ / init_conv_ semantics.

    Conv2d(dim, dim_out*4, 1): kaiming_uniform on a (dim_out, dim, 1, 1) tensor,
    repeated 'o ... -> (o 4) ...' (each base channel repeated 4x, consecutive).
    Bias: zeros.  Weight kept in (out, in) layout -- exactly what the
    weight-stationary kernel consumes, no transpose needed.
    """
    dim_out = dim if dim_out is None else dim_out
    fan_in = dim * 1 * 1
    bound = math.sqrt(2.0) * math.sqrt(3.0 / fan_in)   # kaiming_uniform, a=0
    w_base = jax.random.uniform(
        key, (dim_out, dim), minval=-bound, maxval=bound, dtype=jnp.float32)
    w_full = jnp.repeat(w_base, 4, axis=0)             # (dim_out*4, dim)
    b_full = jnp.zeros((dim_out * 4,), dtype=jnp.float32)
    return {"weight": w_full, "bias": b_full, "dim": dim, "dim_out": dim_out}


@jax.jit
def pixel_shuffle_upsample_forward(x, weight, bias):
    """x: (B, dim, H, W) NCHW f32 -> (B, dim_out, 2H, 2W) NCHW f32."""
    B, C, H, W = x.shape
    N = weight.shape[0]                 # dim_out * 4
    dim_out = N // 4

    y = conv1x1_silu_nchw(x, weight, bias)          # (B, 4*dim_out, H*W)

    # PixelShuffle(2): channel nc = 4*co + 2*r1 + r2 -> (co, row offset r1, col r2)
    # TODO(synk): lane interleave of (w, r2) stays in XLA (single fused transpose).
    y = y.reshape(B, dim_out, 2, 2, H, W)
    y = jnp.transpose(y, (0, 1, 4, 2, 5, 3))        # (B, dim_out, H, 2, W, 2)
    return y.reshape(B, dim_out, 2 * H, 2 * W)


# ---------------------------------------------------------------------------
# Pure-JAX reference (sanity check)
# ---------------------------------------------------------------------------
def _reference_forward(x, weight, bias):
    B, C, H, W = x.shape
    N = weight.shape[0]
    dim_out = N // 4
    y = jnp.einsum("bchw,oc->bohw", x, weight) + bias[None, :, None, None]
    y = y * jax.nn.sigmoid(y)
    y = y.reshape(B, dim_out, 2, 2, H, W)
    y = jnp.transpose(y, (0, 1, 4, 2, 5, 3)).reshape(B, dim_out, 2 * H, 2 * W)
    return y


if __name__ == "__main__":
    key = jax.random.PRNGKey(0)
    k_w, k_x = jax.random.split(key)

    B, dim, H, W = 2, 4, 16, 16
    params = init_pixel_shuffle_upsample_params(k_w, dim)          # dim_out = dim
    x = jax.random.normal(k_x, (B, dim, H, W), dtype=jnp.float32)

    out = pixel_shuffle_upsample_forward(x, params["weight"], params["bias"])
    out = jax.block_until_ready(out)

    assert out.shape == (B, dim, 2 * H, 2 * W), out.shape

    # bf16 matmul + approx reciprocal -> loosened tolerance vs the f32 reference.
    ref = _reference_forward(x, params["weight"], params["bias"])
    max_err = float(jnp.max(jnp.abs(out - ref)))
    assert max_err < 1e-1, f"max abs err {max_err}"

    print("KERNEL_OK")
</pallas_src>

<mosaic_0001>
module attributes {stable_mosaic.version = 11 : i64} {
  func.func @_conv1x1_silu_kernel(%arg0: i32, %arg1: i32, %arg2: i32, %arg3: memref<1x4x256xf32, #tpu.memory_space<vmem>>, %arg4: memref<16x4xbf16, #tpu.memory_space<vmem>>, %arg5: memref<16x1xf32, #tpu.memory_space<vmem>>, %arg6: memref<1x16x256xf32, #tpu.memory_space<vmem>>) attributes {dimension_semantics = [#tpu.dimension_semantics<parallel>, #tpu.dimension_semantics<parallel>, #tpu.dimension_semantics<parallel>], iteration_bounds = array<i64: 2, 1, 1>, scalar_prefetch = 0 : i64, scratch_operands = 0 : i64, tpu.core_type = #tpu.core_type<tc>, window_params = [{transform_indices = @transform_0, window_bounds = array<i64: 1, 4, 256>}, {transform_indices = @transform_1, window_bounds = array<i64: 16, 4>}, {transform_indices = @transform_2, window_bounds = array<i64: 16, 1>}, {transform_indices = @transform_3, window_bounds = array<i64: 1, 16, 256>}]} {
    %c0 = arith.constant 0 : index
    %c0_0 = arith.constant 0 : index
    %c0_1 = arith.constant 0 : index
    %0 = vector.load %arg3[%c0, %c0_0, %c0_1] : memref<1x4x256xf32, #tpu.memory_space<vmem>>, vector<1x4x256xf32>
    %1 = vector.shape_cast %0 : vector<1x4x256xf32> to vector<4x256xf32>
    %2 = arith.truncf %1 : vector<4x256xf32> to vector<4x256xbf16>
    %c0_2 = arith.constant 0 : index
    %c0_3 = arith.constant 0 : index
    %3 = vector.load %arg4[%c0_2, %c0_3] : memref<16x4xbf16, #tpu.memory_space<vmem>>, vector<16x4xbf16>
    %cst = arith.constant dense<0.000000e+00> : vector<16x256xf32>
    %4 = tpu.matmul %3, %2, %cst {dimension_numbers = #tpu.dot_dimension_numbers<[1], [0], [0], [1], [0, 0, 1, 1], [], []>} : vector<16x4xbf16>, vector<4x256xbf16>, vector<16x256xf32> -> vector<16x256xf32>
    %c0_4 = arith.constant 0 : index
    %c0_5 = arith.constant 0 : index
    %5 = vector.load %arg5[%c0_4, %c0_5] : memref<16x1xf32, #tpu.memory_space<vmem>>, vector<16x1xf32>
    %6 = vector.broadcast %5 : vector<16x1xf32> to vector<16x256xf32>
    %7 = arith.addf %4, %6 : vector<16x256xf32>
    %cst_6 = arith.constant 0.000000e+00 : f32
    %8 = vector.broadcast %cst_6 : f32 to vector<16x256xf32>
    %9 = arith.subf %8, %7 : vector<16x256xf32>
    %10 = math.exp %9 : vector<16x256xf32>
    %cst_7 = arith.constant 1.000000e+00 : f32
    %11 = vector.broadcast %cst_7 : f32 to vector<16x256xf32>
    %12 = arith.addf %11, %10 : vector<16x256xf32>
    %13 = tpu.reciprocal %12 {approx = true} : vector<16x256xf32> -> vector<16x256xf32>
    %14 = arith.mulf %7, %13 : vector<16x256xf32>
    %c0_8 = arith.constant 0 : index
    %c0_9 = arith.constant 0 : index
    %c0_10 = arith.constant 0 : index
    %15 = vector.load %arg6[%c0_8, %c0_9, %c0_10] : memref<1x16x256xf32, #tpu.memory_space<vmem>>, vector<1x16x256xf32>
    %16 = vector.shape_cast %15 : vector<1x16x256xf32> to vector<16x256xf32>
    %17 = vector.shape_cast %14 : vector<16x256xf32> to vector<1x16x256xf32>
    tpu.vector_store %arg6[%c0_8, %c0_9, %c0_10], %17 {strides = array<i32>} : memref<1x16x256xf32, #tpu.memory_space<vmem>>, vector<1x16x256xf32>,
    return
  }
  func.func @transform_0(%arg0: i32, %arg1: i32, %arg2: i32) -> (i32, i32, i32) {
    %c0_i32 = arith.constant 0 : i32
    %c0_i32_0 = arith.constant 0 : i32
    return %arg0, %c0_i32, %arg1 : i32, i32, i32
  }
  func.func @transform_1(%arg0: i32, %arg1: i32, %arg2: i32) -> (i32, i32) {
    %c0_i32 = arith.constant 0 : i32
    %c0_i32_0 = arith.constant 0 : i32
    return %arg2, %c0_i32 : i32, i32
  }
  func.func @transform_2(%arg0: i32, %arg1: i32, %arg2: i32) -> (i32, i32) {
    %c0_i32 = arith.constant 0 : i32
    %c0_i32_0 = arith.constant 0 : i32
    return %arg2, %c0_i32 : i32, i32
  }
  func.func @transform_3(%arg0: i32, %arg1: i32, %arg2: i32) -> (i32, i32, i32) {
    %c0_i32 = arith.constant 0 : i32
    return %arg0, %arg2, %arg1 : i32, i32, i32
  }
}

</mosaic_0001>

<bundles_post_ra>
// kernel: pixel_shuffle_upsample_forward.1
= control target key start
LH: loop header
LB: loop body
LE: loop exit
PB: predicated region body
PF: predicated region fallthrough
CT: control target
= control target key end

     0   :  { %s628_s12 = smov 0   ;;  %s630_s13 = smov 0   ;;  %s674_s0 = inlined_call_operand.vmem [shape: f32[2,4,256], index: 0, kind: input, shape index: {}]   ;;  %s675_s1 = inlined_call_operand.vmem [shape: bf16[16,4], index: 1, kind: input, shape index: {}]   ;;  %s676_s2 = inlined_call_operand.vmem [shape: f32[16,1], index: 2, kind: input, shape index: {}]   ;;  %s677_s3 = inlined_call_operand.vmem [shape: f32[2,16,256], index: 3, kind: output, shape index: {}]  }
   0x1   :  { %s632_s14 = smov 0  }
   0x2 LB: > { %s32_s15 = sadd.s32 1, %s601_s13  ;;  %p527_p0 = scmp.ge.s32.totalorder %s605_s14, 1  ;;  %s605_s14 = sphi %s632_s14, %s13_s14   ;;  %s601_s13 = sphi %s630_s13, %s679_s13   ;;  %s597_s12 = sphi %s628_s12, %s678_s12  }
   0x3   : > { %p34_p1 = scmp.ge.s32.totalorder %s32_s15, 2  ;;  %p189_p2 = scmp.lt.s32.totalorder %s605_s14, 3 }
   0x5   : > { %s681_s15 = smov (%p34_p1, %s32_s15), 0  ;;  %p190_p3 = pnand %p527_p0, %p189_p2 }
   0x6   : > { %p237_p4 = scmp.lt.s32.totalorder (!%p190_p3), %s597_s12, 1 }
   0x7   : > { %193 = sbr.rel (%p190_p3) target bundleno = 262 (0x106), region = 32 }
   0xc   : > { %v607_v0 = vmov 0   ;;  %v283_v1 = vld [vmem:[%s676_s2] sm:$0xff]  ;;  %s683_s12 = smov (!%p237_p4, %s597_s12), 1  ;;  %v284_v2 = vld [vmem:[%s676_s2 + $0x8] sm:$0xff]  ;;  %vm304_vm0 = vcmask 1041408   ;;  %vm300_vm1 = vcmask 31744  }
   0xd   : > { %343 = vmatprep.mubr.bf16.mxu0 %v607_v0  ;;  %564 = vset.pattern.permute.xlu0 %v607_v0  ;;  %s537_s20 = sshll.u32 %s683_s12, 3  ;;  %v566_v8 = vld [vmem:[%s675_s1] sm:$0xff]   ;;  %s538_s26 = sshll.u32 %s683_s12, 5 }
   0xe   : > { %287 = vperm.xlu0 %564, %v283_v1   ;;  %s244_s23 = scalar_lea.vmem %s674_s0, %s537_s20  ;;  %s271_s29 = scalar_lea.vmem %s677_s3, %s538_s26 }
   0xf   : > { %v275_v3 = vld [vmem:[%s244_s23] sm:$0xff] }
  0x10   : > { %v277_v4 = vcombine.high %v275_v3, %v275_v3  ;;  %v279_v5 = vpack.c.bf16 %v275_v3, %v275_v3 }
  0x12   : > { %292 = vperm.xlu0 %564, %v284_v2   ;;  %v280_v6 = vpack.c.bf16 %v277_v4, %v277_v4  ;;  %v306_v7 = vsel %vm304_vm0, %v279_v5, 0 }
  0x14   : > { %533 = vmatprep.subr.msk.bf16.mxu0 %vm304_vm0, %v280_v6 }
  0x15   : > { %326 = vmatpush1.bf16.msra.mxu0 %v306_v7 }
  0x18   : > { %534 = vmatmul.mubr.msk.bf16.vlgmr.msra.gmra.mxu0 %vm300_vm1, %v566_v8 }
  0x89   : > { %v288_v9 = vpop.permute.xlu0 %287 }
  0x8d   : > { %v293_v15 = vpop.permute.xlu0 %292 }
  0xd8   : > { %v345_v10 = vpop.f32.mrf.mxu0 }
  0xd9   : > { %v346_v11 = vadd.f32 %v345_v10, %v288_v9 }
  0xda   : > { %v347_v12 = vpop.f32.mrf.mxu0 }
  0xdb   : > { %v354_v13 = vsub.f32 0.0, %v346_v11  ;;  %v348_v14 = vadd.f32 %v347_v12, %v288_v9 }
  0xdc   : > { %v349_v16 = vpop.f32.mrf.mxu0 }
  0xdd   : > { %v358_v17 = vmul.f32 1.442695, %v354_v13  ;;  %v355_v18 = vsub.f32 0.0, %v348_v14  ;;  %v350_v19 = vadd.f32 %v349_v16, %v293_v15 }
  0xde   : > { %v351_v20 = vpop.f32.mrf.mxu0 }
  0xdf   : > { %567 = vpow2.f32 %v358_v17  ;;  %v360_v21 = vmul.f32 1.442695, %v355_v18  ;;  %v356_v22 = vsub.f32 0.0, %v350_v19  ;;  %v352_v23 = vadd.f32 %v351_v20, %v293_v15 }
  0xe1   : > { %569 = vpow2.f32 %v360_v21  ;;  %v362_v24 = vmul.f32 1.442695, %v356_v22  ;;  %v357_v25 = vsub.f32 0.0, %v352_v23 }
  0xe3   : > { %571 = vpow2.f32 %v362_v24  ;;  %v364_v26 = vmul.f32 1.442695, %v357_v25 }
  0xe5   : > { %573 = vpow2.f32 %v364_v26 }
  0xec   : > { %v568_v27 = vpop.eup %567 }
  0xed   : > { %v366_v28 = vadd.f32 1.0, %v568_v27 }
  0xee   : > { %v570_v29 = vpop.eup %569 }
  0xef   : > { %575 = vrcp.f32 %v366_v28  ;;  %v367_v30 = vadd.f32 1.0, %v570_v29 }
  0xf0   : > { %v572_v31 = vpop.eup %571 }
  0xf1   : > { %577 = vrcp.f32 %v367_v30  ;;  %v368_v32 = vadd.f32 1.0, %v572_v31 }
  0xf2   : > { %v574_v33 = vpop.eup %573 }
  0xf3   : > { %579 = vrcp.f32 %v368_v32  ;;  %v369_v34 = vadd.f32 1.0, %v574_v33 }
  0xf5   : > { %581 = vrcp.f32 %v369_v34 }
  0xfc   : > { %v576_v35 = vpop.eup %575 }
  0xfd   : > { %v374_v36 = vmul.f32 %v576_v35, %v346_v11 }
  0xfe   : > { %v578_v37 = vpop.eup %577 }
  0xff   : > { %378 = vst [vmem:[%s271_s29] sm:$0xff] %v374_v36  ;;  %v375_v38 = vmul.f32 %v578_v37, %v348_v14 }
 0x100   : > { %v580_v39 = vpop.eup %579 }
 0x101   : > { %379 = vst [vmem:[%s271_s29 + $0x8] sm:$0xff] %v375_v38  ;;  %v376_v40 = vmul.f32 %v580_v39, %v350_v19 }
 0x102   : > { %v582_v41 = vpop.eup %581 }
 0x103   : > { %380 = vst [vmem:[%s271_s29 + $0x10] sm:$0xff] %v376_v40  ;;  %v377_v42 = vmul.f32 %v582_v41, %v352_v23 }
 0x105   : > { %381 = vst [vmem:[%s271_s29 + $0x18] sm:$0xff] %v377_v42 }
 0x106 PF: > { %s13_s14 = sadd.s32 1, %s605_s14   ;;  %s678_s12 = smov %s601_s13 }
 0x107   : > { %p10_p5 = scmp.ge.s32.totalorder %s13_s14, 4   ;;  %s679_s13 = smov %s681_s15 }
 0x109   :  { %12 = sbr.rel (!%p10_p5) target bundleno = 2 (0x2), region = 68 }

</bundles_post_ra>
